<compile_context>
chip_gen: v7x
topology: tpu7x:2x2x1
jax: 0.10.0
libtpu: 0.0.40
codegen_flags: <defaults>
</compile_context>

<pallas_src>
import functools

import jax
import jax.numpy as jnp
from jax.experimental import pallas as pl
from jax.experimental.pallas import tpu as pltpu

_NEG_BIG = -1e30  # plain Python float -> jaxpr literal, never a captured const


def _round_up(x, m):
    return ((x + m - 1) // m) * m


def _lse_kernel(logits_ref, lse_ref, m_sc, l_sc, *, tail_len):
    """Online logsumexp over class chunks for one row tile.

    logits_ref : (tile_n, tile_c) native dtype, VMEM (auto-pipelined)
    lse_ref    : (tile_n, 1) f32 per-row logsumexp (written on last class chunk)
    m_sc, l_sc : (tile_n, 1) f32 scratch (running max / running sum(exp))
    tail_len   : None if the class dim divides evenly, else #valid lanes in the
                 last class chunk (static).
    """
    j = pl.program_id(1)
    last = pl.num_programs(1) - 1

    @pl.when(j == 0)
    def _():
        m_sc[...] = jnp.full_like(m_sc, _NEG_BIG)
        l_sc[...] = jnp.zeros_like(l_sc)

    def update(x):
        m_chunk = jnp.max(x, axis=-1, keepdims=True)
        m_new = jnp.maximum(m_sc[...], m_chunk)
        alpha = jnp.exp(m_sc[...] - m_new)
        p = jnp.exp(x - m_new)  # masked lanes underflow to 0
        l_sc[...] = alpha * l_sc[...] + jnp.sum(p, axis=-1, keepdims=True)
        m_sc[...] = m_new

    x = logits_ref[...].astype(jnp.float32)  # in-kernel upcast (bf16 -> f32)

    if tail_len is None:
        update(x)
    else:
        # Full chunks skip the mask entirely; only the tail chunk pays for the
        # iota / compare / select.
        @pl.when(j != last)
        def _():
            update(x)

        @pl.when(j == last)
        def _():
            lane = jax.lax.broadcasted_iota(jnp.int32, x.shape, 1)
            update(jnp.where(lane < tail_len, x, _NEG_BIG))

    @pl.when(j == last)
    def _():
        lse_ref[...] = m_sc[...] + jnp.log(l_sc[...])


def cross_entropy_loss(logits, targets, *, tile_n_max=256, tile_c_max=4096):
    """logits: [N, C] float (f32/bf16), targets: [N] int class ids -> scalar f32."""
    n, c = logits.shape
    row_align = 16 if logits.dtype == jnp.bfloat16 else 8

    # --- class tiling: single full-width chunk if it fits, otherwise 128-lane
    # aligned chunks with an in-kernel mask on the tail chunk only (no pad copy).
    if c <= tile_c_max:
        tile_c = c
        tail_len = None
    else:
        tile_c = tile_c_max
        rem = c % tile_c
        tail_len = rem if rem else None

    # --- row tiling: prefer >=2 row tiles so v7x megacore shards the batch axis.
    if n > tile_n_max:
        tile_n = tile_n_max
    elif n >= 2 * row_align:
        tile_n = _round_up((n + 1) // 2, row_align)
    else:
        tile_n = n  # tiny batch: single full-extent row block

    grid = (pl.cdiv(n, tile_n), pl.cdiv(c, tile_c))
    kernel = functools.partial(_lse_kernel, tail_len=tail_len)

    itemsize = jnp.dtype(logits.dtype).itemsize
    cost = pl.CostEstimate(
        flops=4 * n * c,
        transcendentals=n * c,
        bytes_accessed=n * c * itemsize + n * 4,
    )

    lse = pl.pallas_call(
        kernel,
        out_shape=jax.ShapeDtypeStruct((n, 1), jnp.float32),
        grid_spec=pltpu.PrefetchScalarGridSpec(
            num_scalar_prefetch=0,
            grid=grid,
            in_specs=[pl.BlockSpec((tile_n, tile_c), lambda i, j: (i, j))],
            out_specs=pl.BlockSpec((tile_n, 1), lambda i, j: (i, 0)),
            scratch_shapes=[
                pltpu.VMEM((tile_n, 1), jnp.float32),  # running max
                pltpu.VMEM((tile_n, 1), jnp.float32),  # running sum(exp)
            ],
        ),
        compiler_params=pltpu.CompilerParams(
            dimension_semantics=("parallel", "arbitrary")),
        cost_estimate=cost,
    )(logits)

    # Target-logit gather in the wrapper: reads only N elements from HBM.
    tgt = jnp.take_along_axis(
        logits, targets.astype(jnp.int32)[:, None], axis=-1)[:, 0]
    return jnp.mean(lse[:, 0] - tgt.astype(jnp.float32))


def _ref_ce(logits, targets):
    lg = logits.astype(jnp.float32)
    lse = jax.scipy.special.logsumexp(lg, axis=-1)
    tgt = jnp.take_along_axis(lg, targets[:, None].astype(jnp.int32), axis=-1)[:, 0]
    return jnp.mean(lse - tgt)


if __name__ == "__main__":
    key = jax.random.PRNGKey(0)
    k1, k2, k3, k4, k5, k6 = jax.random.split(key, 6)

    # small demo consistent with the module: batch=8, num_classes=32
    N, C = 8, 32
    logits = jax.random.normal(k1, (N, C), dtype=jnp.float32)
    targets = jax.random.randint(k2, (N,), 0, C, dtype=jnp.int32)
    loss = jax.block_until_ready(cross_entropy_loss(logits, targets))
    ref = _ref_ce(logits, targets)
    assert jnp.allclose(loss, ref, rtol=1e-5, atol=1e-5), (loss, ref)

    # misaligned shapes + multiple class chunks: exercises the tail-chunk mask,
    # the online accumulation across the class axis, and a partial row block.
    N2, C2 = 40, 300
    logits2 = jax.random.normal(k3, (N2, C2), dtype=jnp.float32)
    targets2 = jax.random.randint(k4, (N2,), 0, C2, dtype=jnp.int32)
    loss2 = jax.block_until_ready(
        cross_entropy_loss(logits2, targets2, tile_n_max=16, tile_c_max=128))
    ref2 = _ref_ce(logits2, targets2)
    assert jnp.allclose(loss2, ref2, rtol=1e-5, atol=1e-5), (loss2, ref2)

    # bf16 inputs: in-kernel upcast, 16-row sublane alignment, 2-way row split.
    N3, C3 = 32, 200
    logits3 = jax.random.normal(k5, (N3, C3), dtype=jnp.float32).astype(jnp.bfloat16)
    targets3 = jax.random.randint(k6, (N3,), 0, C3, dtype=jnp.int32)
    loss3 = jax.block_until_ready(cross_entropy_loss(logits3, targets3))
    ref3 = _ref_ce(logits3, targets3)
    assert jnp.allclose(loss3, ref3, rtol=1e-4, atol=1e-4), (loss3, ref3)

    print("KERNEL_OK")
</pallas_src>

<mosaic_0001>
module attributes {stable_mosaic.version = 11 : i64} {
  func.func @_lse_kernel(%arg0: i32, %arg1: i32, %arg2: memref<8x32xf32, #tpu.memory_space<vmem>>, %arg3: memref<8x1xf32, #tpu.memory_space<vmem>>, %arg4: memref<8x1xf32, #tpu.memory_space<vmem>>, %arg5: memref<8x1xf32, #tpu.memory_space<vmem>>) attributes {dimension_semantics = [#tpu.dimension_semantics<parallel>, #tpu.dimension_semantics<arbitrary>], iteration_bounds = array<i64: 1, 1>, scalar_prefetch = 0 : i64, scratch_operands = 2 : i64, tpu.core_type = #tpu.core_type<tc>, window_params = [{transform_indices = @transform_0, window_bounds = array<i64: 8, 32>}, {transform_indices = @transform_1, window_bounds = array<i64: 8, 1>}]} {
    %c0_i32 = arith.constant 0 : i32
    %0 = arith.cmpi eq, %arg1, %c0_i32 : i32
    %1 = arith.extui %0 : i1 to i32
    %c0_i32_0 = arith.constant 0 : i32
    %2 = arith.cmpi ne, %1, %c0_i32_0 : i32
    scf.if %2 {
      %cst_15 = arith.constant -1.000000e+30 : f32
      %24 = vector.broadcast %cst_15 : f32 to vector<8x1xf32>
      %c0_16 = arith.constant 0 : index
      %c0_17 = arith.constant 0 : index
      %25 = vector.load %arg4[%c0_16, %c0_17] : memref<8x1xf32, #tpu.memory_space<vmem>>, vector<8x1xf32>
      tpu.vector_store %arg4[%c0_16, %c0_17], %24 {strides = array<i32>} : memref<8x1xf32, #tpu.memory_space<vmem>>, vector<8x1xf32>,
      %cst_18 = arith.constant 0.000000e+00 : f32
      %26 = vector.broadcast %cst_18 : f32 to vector<8x1xf32>
      %c0_19 = arith.constant 0 : index
      %c0_20 = arith.constant 0 : index
      %27 = vector.load %arg5[%c0_19, %c0_20] : memref<8x1xf32, #tpu.memory_space<vmem>>, vector<8x1xf32>
      tpu.vector_store %arg5[%c0_19, %c0_20], %26 {strides = array<i32>} : memref<8x1xf32, #tpu.memory_space<vmem>>, vector<8x1xf32>,
    } else {
    }
    %c0 = arith.constant 0 : index
    %c0_1 = arith.constant 0 : index
    %3 = vector.load %arg2[%c0, %c0_1] : memref<8x32xf32, #tpu.memory_space<vmem>>, vector<8x32xf32>
    %cst = arith.constant dense<0xFF800000> : vector<8xf32>
    %4 = vector.multi_reduction <maximumf>, %3, %cst [1] : vector<8x32xf32> to vector<8xf32>
    %5 = vector.shape_cast %4 : vector<8xf32> to vector<8x1xf32>
    %c0_2 = arith.constant 0 : index
    %c0_3 = arith.constant 0 : index
    %6 = vector.load %arg4[%c0_2, %c0_3] : memref<8x1xf32, #tpu.memory_space<vmem>>, vector<8x1xf32>
    %7 = arith.maximumf %6, %5 : vector<8x1xf32>
    %c0_4 = arith.constant 0 : index
    %c0_5 = arith.constant 0 : index
    %8 = vector.load %arg4[%c0_4, %c0_5] : memref<8x1xf32, #tpu.memory_space<vmem>>, vector<8x1xf32>
    %9 = arith.subf %8, %7 : vector<8x1xf32>
    %10 = math.exp %9 : vector<8x1xf32>
    %11 = vector.broadcast %7 : vector<8x1xf32> to vector<8x32xf32>
    %12 = arith.subf %3, %11 : vector<8x32xf32>
    %13 = math.exp %12 : vector<8x32xf32>
    %c0_6 = arith.constant 0 : index
    %c0_7 = arith.constant 0 : index
    %14 = vector.load %arg5[%c0_6, %c0_7] : memref<8x1xf32, #tpu.memory_space<vmem>>, vector<8x1xf32>
    %15 = arith.mulf %10, %14 : vector<8x1xf32>
    %cst_8 = arith.constant dense<0.000000e+00> : vector<8xf32>
    %16 = vector.multi_reduction <add>, %13, %cst_8 [1] : vector<8x32xf32> to vector<8xf32>
    %17 = vector.shape_cast %16 : vector<8xf32> to vector<8x1xf32>
    %18 = arith.addf %15, %17 : vector<8x1xf32>
    %c0_9 = arith.constant 0 : index
    %c0_10 = arith.constant 0 : index
    %19 = vector.load %arg5[%c0_9, %c0_10] : memref<8x1xf32, #tpu.memory_space<vmem>>, vector<8x1xf32>
    tpu.vector_store %arg5[%c0_9, %c0_10], %18 {strides = array<i32>} : memref<8x1xf32, #tpu.memory_space<vmem>>, vector<8x1xf32>,
    %c0_11 = arith.constant 0 : index
    %c0_12 = arith.constant 0 : index
    %20 = vector.load %arg4[%c0_11, %c0_12] : memref<8x1xf32, #tpu.memory_space<vmem>>, vector<8x1xf32>
    tpu.vector_store %arg4[%c0_11, %c0_12], %7 {strides = array<i32>} : memref<8x1xf32, #tpu.memory_space<vmem>>, vector<8x1xf32>,
    %c0_i32_13 = arith.constant 0 : i32
    %21 = arith.cmpi eq, %arg1, %c0_i32_13 : i32
    %22 = arith.extui %21 : i1 to i32
    %c0_i32_14 = arith.constant 0 : i32
    %23 = arith.cmpi ne, %22, %c0_i32_14 : i32
    scf.if %23 {
      %c0_15 = arith.constant 0 : index
      %c0_16 = arith.constant 0 : index
      %24 = vector.load %arg4[%c0_15, %c0_16] : memref<8x1xf32, #tpu.memory_space<vmem>>, vector<8x1xf32>
      %c0_17 = arith.constant 0 : index
      %c0_18 = arith.constant 0 : index
      %25 = vector.load %arg5[%c0_17, %c0_18] : memref<8x1xf32, #tpu.memory_space<vmem>>, vector<8x1xf32>
      %26 = math.log %25 : vector<8x1xf32>
      %27 = arith.addf %24, %26 : vector<8x1xf32>
      %c0_19 = arith.constant 0 : index
      %c0_20 = arith.constant 0 : index
      %28 = vector.load %arg3[%c0_19, %c0_20] : memref<8x1xf32, #tpu.memory_space<vmem>>, vector<8x1xf32>
      tpu.vector_store %arg3[%c0_19, %c0_20], %27 {strides = array<i32>} : memref<8x1xf32, #tpu.memory_space<vmem>>, vector<8x1xf32>,
    } else {
    }
    return
  }
  func.func @transform_0(%arg0: i32, %arg1: i32) -> (i32, i32) {
    %c0_i32 = arith.constant 0 : i32
    return %arg0, %arg1 : i32, i32
  }
  func.func @transform_1(%arg0: i32, %arg1: i32) -> (i32, i32) {
    %c0_i32 = arith.constant 0 : i32
    %c0_i32_0 = arith.constant 0 : i32
    return %arg0, %c0_i32 : i32, i32
  }
}

</mosaic_0001>

<bundles_post_ra>
// kernel: tpu_custom_call.1
= control target key start
LH: loop header
LB: loop body
LE: loop exit
PB: predicated region body
PF: predicated region fallthrough
CT: control target
= control target key end

     0   :  { %6 = vsyncpa [#allocation5], 0  ;;  %s103_s6 = smov [#allocation4]   ;;  %s139_s0 = inlined_call_operand.hbm [shape: f32[8,32], index: 0, kind: input, shape index: {}]   ;;  %s140_s1 = inlined_call_operand.vmem [shape: f32[8,1], index: 1, kind: output, shape index: {}]  }
   0x1   :  { %s13_s7 = sshll.u32 %s103_s6, 4  ;;  %s79_s10 = scalar_lea.hbm %s139_s0, 128  ;;  %s14_s7 = int_to_ptr.vmem [resolvable:$true] %s13_s7 }
   0x2   :  { %p80_p0 = scmp.ne.s32.totalorder %s139_s0, %s79_s10  ;;  %p83_p1 = scmp.lt.u32.totalorder %s79_s10, %s139_s0 }
   0x4   :  { %p85_p2 = pnand %p83_p1, %p80_p0 }
   0x6   :  { %88 = shalt.err (!%p85_p2)
}
   0x7   :  { %s89_s15 = scalar_lea.vmem %s14_s7, 128  ;;  %p94_p4 = scmp.lt.s32.totalorder %s14_s7, %s14_s7 }
   0x8   :  { %p90_p3 = scmp.ne.s32.totalorder %s14_s7, %s89_s15  ;;  %p95_p5 = scmp.lt.s32.totalorder %s89_s15, %s89_s15 }
   0xa   :  { %p96_p6 = por %p95_p5, %p94_p4 }
   0xc   :  { %p97_p7 = pnand %p96_p6, %p90_p3 }
   0xe   :  { %100 = shalt.err (!%p97_p7)
}
   0xf   :  { %16 = dma.hbm_to_vmem [thread:$0]  %s139_s0, 128, %s14_s7, [#allocation5]  }
  0x10   :  { %101 = dma.done.wait [#allocation5], 128  }
  0x11   :  { %102 = vsyncadd [#allocation5], 4294967168  ;;  %vm24_vm0 = vcmask 7168   ;;  %v104_v0 = vmov -1e+30   ;;  %vm28_vm1 = vcmask 261120  }
  0x12   :  { %25 = vst.msk [vmem:[#allocation2] sm:$0xff] %vm24_vm0, %v104_v0  ;;  %v27_v1 = vld [vmem:[#allocation4] sm:$0xff]  ;;  %v105_v3 = vmov 0   ;;  %v106_v4 = vmov 0.0  }
  0x13   :  { %v29_v2 = vsel %vm28_vm1, %v27_v1, -inf  ;;  %72 = vset.pattern.permute.xlu0 %v105_v3  ;;  %26 = vst.msk [vmem:[#allocation3] sm:$0xff] %vm24_vm0, %v106_v4 }
  0x14   :  { %30 = vmax.xlane.f32.xlu0 %v29_v2 }
  0x19   :  { %v32_v5 = vld [vmem:[#allocation2] sm:$0xff] }
  0x1a   :  { %v45_v16 = vld [vmem:[#allocation3] sm:$0xff] }
  0xa1   :  { %v31_v6 = vpop.xlane.xlu0 %30 }
  0xa2   :  { %v33_v7 = vmax.f32 %v32_v5, %v31_v6 }
  0xa4   :  { %v34_v8 = vsub.f32 %v32_v5, %v33_v7  ;;  %53 = vst.msk [vmem:[#allocation2] sm:$0xff] %vm24_vm0, %v33_v7  ;;  %39 = vperm.xlu0 %72, %v33_v7  }
  0xa6   :  { %v35_v14 = vmul.f32 1.442695, %v34_v8 }
  0xab   :  { %v57_v23 = vld [vmem:[#allocation2] sm:$0xff] }
 0x123   :  { %v40_v9 = vpop.permute.xlu0 %39 }
 0x124   :  { %v42_v10 = vsub.f32 %v27_v1, %v40_v9 }
 0x126   :  { %v43_v11 = vmul.f32 1.442695, %v42_v10 }
 0x128   :  { %73 = vpow2.f32 %v43_v11 }
 0x129   :  { %75 = vpow2.f32 %v35_v14 }
 0x132   :  { %v74_v12 = vpop.eup %73 }
 0x133   :  { %v47_v13 = vsel %vm28_vm1, %v74_v12, 0.0  ;;  %v76_v15 = vpop.eup %75 }
 0x134   :  { %48 = vadd.xlane.f32.xlu1 %v47_v13  ;;  %v46_v17 = vmul.f32 %v76_v15, %v45_v16 }
 0x1c1   :  { %v49_v18 = vpop.xlane.xlu1 %48 }
 0x1c2   :  { %v50_v19 = vadd.f32 %v49_v18, %v46_v17 }
 0x1c4   :  { %52 = vst.msk [vmem:[#allocation3] sm:$0xff] %vm24_vm0, %v50_v19 }
 0x1cb   :  { %v58_v20 = vld [vmem:[#allocation3] sm:$0xff] }
 0x1cc   :  { %77 = vlog2.f32 %v58_v20 }
 0x1d6   :  { %v78_v21 = vpop.eup %77 }
 0x1d7   :  { %v60_v22 = vmul.f32 0.6931472, %v78_v21 }
 0x1d9   :  { %v61_v24 = vadd.f32 %v60_v22, %v57_v23 }
 0x1db   :  { %62 = vst.msk [vmem:[%s140_s1] sm:$0xff] %vm24_vm0, %v61_v24 }
 0x1dc   :  { %67 = vsyncpa [#allocation5], 1 }

</bundles_post_ra>
